<compile_context>
chip_gen: v7x
topology: tpu7x:2x2x1
jax: 0.10.0
libtpu: 0.0.40
codegen_flags: <defaults>
</compile_context>

<pallas_src>
import functools

import jax
import jax.numpy as jnp
from jax.experimental import pallas as pl
from jax.experimental.pallas import tpu as pltpu


LANE = 128              # vreg lane width
ROW_ALIGN = 16          # bf16 sublane packing (row-tile granularity)
TARGET_GRID_STEPS = 8   # aim for >=2 (ideally 4-8) grid steps: 2-TC split + DMA/compute overlap


def _round_up(x, m):
    return (x + m - 1) // m * m


def _vmem_capacity_bytes():
    """Per-core physical VMEM (generation-aware); conservative fallback = v7x's 64 MiB."""
    try:
        cap = int(pltpu.get_tpu_info().vmem_capacity_bytes)
        if cap > 0:
            return cap
    except Exception:
        pass
    return 64 * 1024 * 1024


# ----------------------------------------------------------------------------
# Fused Pallas kernel: encoder dense + tanh + NSP head + log-softmax
# ----------------------------------------------------------------------------

def _nsp_fused_kernel(x_ref, we_ref, be_ref, wh_ref, bh_ref, o_ref, *, n_classes):
    # x:  [TB, H]  bf16   CLS-embedding row tile
    # we: [H,  H]  bf16   encoder dense weight (grid-invariant, VMEM-resident)
    # be: [1,  H]  f32
    # wh: [H,  Cp] bf16   NSP head weight, class dim zero-padded to 128 lanes
    # bh: [1,  Cp] f32
    # o:  [TB, Cp] f32    log-probs (padded lanes hold don't-care finite values)
    h = jnp.dot(x_ref[...], we_ref[...], preferred_element_type=jnp.float32)
    h = jnp.tanh(h + be_ref[...])                                        # f32 [TB, H]

    logits = jnp.dot(h.astype(wh_ref.dtype), wh_ref[...],
                     preferred_element_type=jnp.float32) + bh_ref[...]   # f32 [TB, Cp]

    # Numerically-stable log-softmax restricted to the first n_classes lanes.
    # The 128-lane exp/max is EUP/XLU filler on otherwise-idle slots; a 2-class
    # slice-based variant would force sub-128-lane layout copies, so keep this.
    col = jax.lax.broadcasted_iota(jnp.int32, logits.shape, 1)
    valid = col < n_classes
    m = jnp.max(jnp.where(valid, logits, -jnp.inf), axis=-1, keepdims=True)
    shifted = logits - m
    denom = jnp.sum(jnp.where(valid, jnp.exp(shifted), 0.0), axis=-1, keepdims=True)
    o_ref[...] = shifted - jnp.log(denom)


# ----------------------------------------------------------------------------
# Tiling policy
# ----------------------------------------------------------------------------

def _pick_tile_rows(b_pad, h, c_pad, vmem_budget):
    """Largest row tile (multiple of 16) such that
         resident weights (worst-case double-buffered)
       + double-buffered x / out tiles
       + in-kernel f32/bf16 intermediates
    stay under `vmem_budget`, additionally capped so the row grid keeps roughly
    TARGET_GRID_STEPS steps (megacore sharding on v7x + DMA/compute overlap)."""
    # NOTE: weight/bias specs are grid-invariant (index_map == (0, 0)); budget
    # assumes worst-case 2x buffering of them anyway.
    resident = 2 * (h * h * 2 + h * c_pad * 2 + h * 4 + c_pad * 4)
    per_row = (2 * h * 2            # x tile, bf16, double-buffered
               + 2 * c_pad * 4      # out tile, f32, double-buffered
               + h * 4 + h * 2      # f32 hidden tile + its bf16 cast copy
               + c_pad * 16)        # logits / exp / where temporaries
    avail = vmem_budget - resident
    rows_cap = max(ROW_ALIGN, (avail // per_row) if avail > 0 else ROW_ALIGN)
    rows_cap = rows_cap // ROW_ALIGN * ROW_ALIGN
    rows_target = max(ROW_ALIGN, _round_up(pl.cdiv(b_pad, TARGET_GRID_STEPS), ROW_ALIGN))
    # TODO(synk): for very large H (resident weights alone near the budget) the
    # encoder weight would need K-tiling / single-buffering; not needed here.
    return max(ROW_ALIGN, min(b_pad, rows_cap, rows_target))


# ----------------------------------------------------------------------------
# Wrapper
# ----------------------------------------------------------------------------

def nsp_head_fused(cls_emb_bf16, enc_w, enc_b, head_w_pad, head_b_pad, *, n_classes=2):
    """log_softmax(tanh(cls @ enc_w + enc_b) @ head_w + head_b) -> [B, n_classes].

    Expects weights already kernel-prepped (bf16, class dim padded to 128 lanes)."""
    b, h = cls_emb_bf16.shape
    c_pad = head_w_pad.shape[1]
    assert c_pad % LANE == 0 and enc_w.shape == (h, h)

    capacity = _vmem_capacity_bytes()
    vmem_budget = int(capacity * 0.80)          # ~51 MiB on v7x, ~102 MiB on v5e/v6e

    b_pad = _round_up(b, ROW_ALIGN)
    tile_b = _pick_tile_rows(b_pad, h, c_pad, vmem_budget)
    b_pad = _round_up(b_pad, tile_b)
    grid = (b_pad // tile_b,)

    # Zero-pad batch rows only; weights/biases are pre-padded once in prepare_params.
    x = jnp.pad(cls_emb_bf16, ((0, b_pad - b), (0, 0)))

    cost = pl.CostEstimate(
        flops=2 * b_pad * h * h + 2 * b_pad * h * c_pad,
        transcendentals=b_pad * (h + c_pad),
        bytes_accessed=(b_pad * h * 2 + h * h * 2 + h * c_pad * 2
                        + b_pad * c_pad * 4 + (h + c_pad) * 4),
    )

    vmem = pltpu.MemorySpace.VMEM
    out = pl.pallas_call(
        functools.partial(_nsp_fused_kernel, n_classes=n_classes),
        out_shape=jax.ShapeDtypeStruct((b_pad, c_pad), jnp.float32),
        grid=grid,
        in_specs=[
            pl.BlockSpec((tile_b, h), lambda i: (i, 0), memory_space=vmem),   # x row tile
            pl.BlockSpec((h, h), lambda i: (0, 0), memory_space=vmem),        # enc W (resident)
            pl.BlockSpec((1, h), lambda i: (0, 0), memory_space=vmem),        # enc b (resident)
            pl.BlockSpec((h, c_pad), lambda i: (0, 0), memory_space=vmem),    # head W (resident)
            pl.BlockSpec((1, c_pad), lambda i: (0, 0), memory_space=vmem),    # head b (resident)
        ],
        out_specs=pl.BlockSpec((tile_b, c_pad), lambda i: (i, 0), memory_space=vmem),
        compiler_params=pltpu.CompilerParams(
            # TODO(synk): on v7x, pltpu.CORE_PARALLEL on the row axis would *guarantee*
            # the 2-TensorCore split; PARALLEL is used as the portable/safe choice.
            dimension_semantics=(pltpu.PARALLEL,),
            vmem_limit_bytes=vmem_budget,
        ),
        cost_estimate=cost,
    )(x, enc_w, enc_b, head_w_pad, head_b_pad)
    return out[:b, :n_classes]


# ----------------------------------------------------------------------------
# Parameters (raw f32, torch-like) and one-time kernel prep
# ----------------------------------------------------------------------------

def init_params(key, vocab_size, seq_len, hidden_dim):
    ks = jax.random.split(key, 6)
    scale = 0.02
    return {
        "tok_emb": scale * jax.random.normal(ks[0], (vocab_size, hidden_dim), jnp.float32),
        "seg_emb": scale * jax.random.normal(ks[1], (2, hidden_dim), jnp.float32),
        "pos_emb": scale * jax.random.normal(ks[2], (seq_len, hidden_dim), jnp.float32),
        "enc_w":   scale * jax.random.normal(ks[3], (hidden_dim, hidden_dim), jnp.float32),
        "enc_b":   jnp.zeros((hidden_dim,), jnp.float32),
        # torch.nn.Linear(hidden_dim, 2): weight [2, H] -> stored transposed [H, 2]
        "head_w":  scale * jax.random.normal(ks[4], (hidden_dim, 2), jnp.float32),
        "head_b":  scale * jax.random.normal(ks[5], (2,), jnp.float32),
    }


def prepare_params(params, *, n_classes=2):
    """One-time kernel-ready prep, hoisted OUT of the per-call path:
    bf16 MXU operands (f32 accumulation stays in-kernel), class dim zero-padded
    to one full 128-lane tile so output stores are unmasked / lane-dense."""
    h = params["enc_w"].shape[0]
    c_pad = _round_up(max(n_classes, LANE), LANE)
    head_w_pad = (jnp.zeros((h, c_pad), jnp.bfloat16)
                  .at[:, :n_classes].set(params["head_w"].astype(jnp.bfloat16)))
    head_b_pad = (jnp.zeros((1, c_pad), jnp.float32)
                  .at[:, :n_classes].set(params["head_b"].reshape(1, n_classes)))
    return {
        "tok_emb":    params["tok_emb"],
        "seg_emb":    params["seg_emb"],
        "pos_emb0":   params["pos_emb"][0],
        "enc_w":      params["enc_w"].astype(jnp.bfloat16),
        "enc_b":      params["enc_b"].reshape(1, h).astype(jnp.float32),
        "head_w_pad": head_w_pad,
        "head_b_pad": head_b_pad,
    }


# ----------------------------------------------------------------------------
# NSPModel forward (CLS gather in plain JAX, hot path in one Pallas kernel)
# ----------------------------------------------------------------------------

def nsp_model_forward(prepped, inputs_ids, segm_ids):
    """Mirrors NSPModel.forward:
        sentence_embed = bert_model(inputs_ids, segm_ids)            # [B, S, H]
        return log_softmax(linear(sentence_embed[:, 0]), axis=-1)    # [B, 2]
    """
    # TODO(synk): bert_model is an externally-injected module in the original code; it is
    # replaced by a synthetic, strictly per-token encoder (tok+seg+pos embed -> dense -> tanh).
    # Only sentence_embed[:, 0] feeds the NSP head, so the encoder runs on the CLS row only;
    # a real attention encoder would need the full sequence.
    # TODO(synk): the CLS-row gather could be fused into the kernel via scalar prefetch +
    # per-row DMA; kept in XLA here (direct bf16 result, single fused pass) for robustness.
    cls = (jnp.take(prepped["tok_emb"], inputs_ids[:, 0], axis=0)
           + jnp.take(prepped["seg_emb"], segm_ids[:, 0], axis=0)
           + prepped["pos_emb0"][None, :]).astype(jnp.bfloat16)        # [B, H] bf16
    return nsp_head_fused(cls, prepped["enc_w"], prepped["enc_b"],
                          prepped["head_w_pad"], prepped["head_b_pad"], n_classes=2)


if __name__ == "__main__":
    # Small but lane-aligned shapes: H multiple of 128 (lane density).
    B, S, H, VOCAB = 2, 8, 128, 100

    key = jax.random.PRNGKey(0)
    k_param, k_ids, k_seg = jax.random.split(key, 3)

    params = init_params(k_param, VOCAB, S, H)
    prepped = prepare_params(params)           # one-time pad/cast, outside the hot path
    inputs_ids = jax.random.randint(k_ids, (B, S), 0, VOCAB, dtype=jnp.int32)
    segm_ids = jax.random.randint(k_seg, (B, S), 0, 2, dtype=jnp.int32)

    fwd = jax.jit(nsp_model_forward)
    log_probs = fwd(prepped, inputs_ids, segm_ids)
    jax.block_until_ready(log_probs)

    # Pure-JAX f32 reference for correctness.
    cls_ref = (params["tok_emb"][inputs_ids[:, 0]]
               + params["seg_emb"][segm_ids[:, 0]]
               + params["pos_emb"][0][None, :])
    hidden = jnp.tanh(cls_ref @ params["enc_w"] + params["enc_b"][None, :])
    logits = hidden @ params["head_w"] + params["head_b"][None, :]
    ref = jax.nn.log_softmax(logits, axis=-1)

    assert log_probs.shape == (B, 2)
    assert jnp.allclose(jnp.exp(log_probs).sum(axis=-1), 1.0, atol=1e-5)
    # bf16 MXU operands vs f32 reference -> loose tolerance (documented).
    assert jnp.allclose(log_probs, ref, atol=2e-2)

    print("KERNEL_OK")
</pallas_src>

<mosaic_0001>
module attributes {stable_mosaic.version = 11 : i64} {
  func.func @_nsp_fused_kernel(%arg0: i32, %arg1: memref<16x128xbf16, #tpu.memory_space<vmem>>, %arg2: memref<128x128xbf16, #tpu.memory_space<vmem>>, %arg3: memref<1x128xf32, #tpu.memory_space<vmem>>, %arg4: memref<128x128xbf16, #tpu.memory_space<vmem>>, %arg5: memref<1x128xf32, #tpu.memory_space<vmem>>, %arg6: memref<16x128xf32, #tpu.memory_space<vmem>>) attributes {dimension_semantics = [#tpu.dimension_semantics<parallel>], iteration_bounds = array<i64: 1>, scalar_prefetch = 0 : i64, scratch_operands = 0 : i64, tpu.core_type = #tpu.core_type<tc>, window_params = [{transform_indices = @transform_0, window_bounds = array<i64: 16, 128>}, {pipeline_mode = #tpu.pipeline_mode<synchronous>, transform_indices = @transform_1, window_bounds = array<i64: 128, 128>}, {pipeline_mode = #tpu.pipeline_mode<synchronous>, transform_indices = @transform_2, window_bounds = array<i64: 1, 128>}, {pipeline_mode = #tpu.pipeline_mode<synchronous>, transform_indices = @transform_3, window_bounds = array<i64: 128, 128>}, {pipeline_mode = #tpu.pipeline_mode<synchronous>, transform_indices = @transform_4, window_bounds = array<i64: 1, 128>}, {transform_indices = @transform_5, window_bounds = array<i64: 16, 128>}]} {
    %c0 = arith.constant 0 : index
    %c0_0 = arith.constant 0 : index
    %0 = vector.load %arg1[%c0, %c0_0] : memref<16x128xbf16, #tpu.memory_space<vmem>>, vector<16x128xbf16>
    %c0_1 = arith.constant 0 : index
    %c0_2 = arith.constant 0 : index
    %1 = vector.load %arg2[%c0_1, %c0_2] : memref<128x128xbf16, #tpu.memory_space<vmem>>, vector<128x128xbf16>
    %cst = arith.constant dense<0.000000e+00> : vector<16x128xf32>
    %2 = tpu.matmul %0, %1, %cst {dimension_numbers = #tpu.dot_dimension_numbers<[1], [0], [0], [1], [0, 0, 1, 1], [], []>} : vector<16x128xbf16>, vector<128x128xbf16>, vector<16x128xf32> -> vector<16x128xf32>
    %c0_3 = arith.constant 0 : index
    %c0_4 = arith.constant 0 : index
    %3 = vector.load %arg3[%c0_3, %c0_4] : memref<1x128xf32, #tpu.memory_space<vmem>>, vector<1x128xf32>
    %4 = vector.broadcast %3 : vector<1x128xf32> to vector<16x128xf32>
    %5 = arith.addf %2, %4 : vector<16x128xf32>
    %6 = math.tanh %5 : vector<16x128xf32>
    %7 = arith.truncf %6 : vector<16x128xf32> to vector<16x128xbf16>
    %c0_5 = arith.constant 0 : index
    %c0_6 = arith.constant 0 : index
    %8 = vector.load %arg4[%c0_5, %c0_6] : memref<128x128xbf16, #tpu.memory_space<vmem>>, vector<128x128xbf16>
    %cst_7 = arith.constant dense<0.000000e+00> : vector<16x128xf32>
    %9 = tpu.matmul %7, %8, %cst_7 {dimension_numbers = #tpu.dot_dimension_numbers<[1], [0], [0], [1], [0, 0, 1, 1], [], []>} : vector<16x128xbf16>, vector<128x128xbf16>, vector<16x128xf32> -> vector<16x128xf32>
    %c0_8 = arith.constant 0 : index
    %c0_9 = arith.constant 0 : index
    %10 = vector.load %arg5[%c0_8, %c0_9] : memref<1x128xf32, #tpu.memory_space<vmem>>, vector<1x128xf32>
    %11 = vector.broadcast %10 : vector<1x128xf32> to vector<16x128xf32>
    %12 = arith.addf %9, %11 : vector<16x128xf32>
    %13 = tpu.iota {dimensions = array<i32: 1>} : vector<16x128xi32>
    %c2_i32 = arith.constant 2 : i32
    %14 = vector.broadcast %c2_i32 : i32 to vector<16x128xi32>
    %15 = arith.cmpi slt, %13, %14 : vector<16x128xi32>
    %cst_10 = arith.constant 0xFF800000 : f32
    %16 = vector.broadcast %cst_10 : f32 to vector<16x128xf32>
    %17 = arith.select %15, %12, %16 : vector<16x128xi1>, vector<16x128xf32>
    %cst_11 = arith.constant dense<0xFF800000> : vector<16xf32>
    %18 = vector.multi_reduction <maximumf>, %17, %cst_11 [1] : vector<16x128xf32> to vector<16xf32>
    %19 = vector.shape_cast %18 : vector<16xf32> to vector<16x1xf32>
    %20 = vector.broadcast %19 : vector<16x1xf32> to vector<16x128xf32>
    %21 = arith.subf %12, %20 : vector<16x128xf32>
    %22 = math.exp %21 : vector<16x128xf32>
    %cst_12 = arith.constant 0.000000e+00 : f32
    %23 = vector.broadcast %cst_12 : f32 to vector<16x128xf32>
    %24 = arith.select %15, %22, %23 : vector<16x128xi1>, vector<16x128xf32>
    %cst_13 = arith.constant dense<0.000000e+00> : vector<16xf32>
    %25 = vector.multi_reduction <add>, %24, %cst_13 [1] : vector<16x128xf32> to vector<16xf32>
    %26 = vector.shape_cast %25 : vector<16xf32> to vector<16x1xf32>
    %27 = math.log %26 : vector<16x1xf32>
    %28 = vector.broadcast %27 : vector<16x1xf32> to vector<16x128xf32>
    %29 = arith.subf %21, %28 : vector<16x128xf32>
    %c0_14 = arith.constant 0 : index
    %c0_15 = arith.constant 0 : index
    %30 = vector.load %arg6[%c0_14, %c0_15] : memref<16x128xf32, #tpu.memory_space<vmem>>, vector<16x128xf32>
    tpu.vector_store %arg6[%c0_14, %c0_15], %29 {strides = array<i32>} : memref<16x128xf32, #tpu.memory_space<vmem>>, vector<16x128xf32>,
    return
  }
  func.func @transform_0(%arg0: i32) -> (i32, i32) {
    %c0_i32 = arith.constant 0 : i32
    %c0_i32_0 = arith.constant 0 : i32
    return %arg0, %c0_i32 : i32, i32
  }
  func.func @transform_1(%arg0: i32) -> (i32, i32) {
    %c0_i32 = arith.constant 0 : i32
    %c0_i32_0 = arith.constant 0 : i32
    %c0_i32_1 = arith.constant 0 : i32
    return %c0_i32, %c0_i32_0 : i32, i32
  }
  func.func @transform_2(%arg0: i32) -> (i32, i32) {
    %c0_i32 = arith.constant 0 : i32
    %c0_i32_0 = arith.constant 0 : i32
    %c0_i32_1 = arith.constant 0 : i32
    return %c0_i32, %c0_i32_0 : i32, i32
  }
  func.func @transform_3(%arg0: i32) -> (i32, i32) {
    %c0_i32 = arith.constant 0 : i32
    %c0_i32_0 = arith.constant 0 : i32
    %c0_i32_1 = arith.constant 0 : i32
    return %c0_i32, %c0_i32_0 : i32, i32
  }
  func.func @transform_4(%arg0: i32) -> (i32, i32) {
    %c0_i32 = arith.constant 0 : i32
    %c0_i32_0 = arith.constant 0 : i32
    %c0_i32_1 = arith.constant 0 : i32
    return %c0_i32, %c0_i32_0 : i32, i32
  }
  func.func @transform_5(%arg0: i32) -> (i32, i32) {
    %c0_i32 = arith.constant 0 : i32
    %c0_i32_0 = arith.constant 0 : i32
    return %arg0, %c0_i32 : i32, i32
  }
}

</mosaic_0001>

<bundles_post_ra>
// kernel: nsp_model_forward.1
= control target key start
LH: loop header
LB: loop body
LE: loop exit
PB: predicated region body
PF: predicated region fallthrough
CT: control target
= control target key end

     0   :  { %10 = vsyncpa [#allocation3], 0  ;;  %s439_s18 = smov [#allocation2]   ;;  %s529_s0 = inlined_call_operand.vmem [shape: bf16[16,128], index: 0, kind: input, shape index: {}]   ;;  %s530_s1 = inlined_call_operand.vmem [shape: bf16[128,128], index: 1, kind: input, shape index: {}]   ;;  %s531_s2 = inlined_call_operand.vmem [shape: f32[1,128], index: 2, kind: input, shape index: {}]   ;;  %s532_s3 = inlined_call_operand.hbm [shape: bf16[128,128], index: 3, kind: input, shape index: {}]   ;;  %s533_s4 = inlined_call_operand.vmem [shape: f32[1,128], index: 4, kind: input, shape index: {}]   ;;  %s534_s5 = inlined_call_operand.vmem [shape: f32[16,128], index: 5, kind: output, shape index: {}]  }
   0x1   :  { %s22_s19 = sshll.u32 %s439_s18, 4  ;;  %s415_s22 = scalar_lea.hbm %s532_s3, 1024  ;;  %s23_s19 = int_to_ptr.vmem [resolvable:$true] %s22_s19 }
   0x2   :  { %p416_p0 = scmp.ne.s32.totalorder %s532_s3, %s415_s22  ;;  %p419_p1 = scmp.lt.u32.totalorder %s415_s22, %s532_s3 }
   0x4   :  { %p421_p2 = pnand %p419_p1, %p416_p0 }
   0x6   :  { %424 = shalt.err (!%p421_p2)
}
   0x7   :  { %s425_s27 = scalar_lea.vmem %s23_s19, 1024  ;;  %p430_p4 = scmp.lt.s32.totalorder %s23_s19, %s23_s19 }
   0x8   :  { %p426_p3 = scmp.ne.s32.totalorder %s23_s19, %s425_s27  ;;  %p431_p5 = scmp.lt.s32.totalorder %s425_s27, %s425_s27 }
   0xa   :  { %p432_p6 = por %p431_p5, %p430_p4 }
   0xc   :  { %p433_p7 = pnand %p432_p6, %p426_p3 }
   0xe   :  { %436 = shalt.err (!%p433_p7)
}
   0xf   :  { %s440_s28 = smov 64   ;;  %s441_s29 = smov 4  }
  0x10   :  { %28 = dma.hbm_to_vmem [thread:$0]  %s532_s3, 1024, %s23_s19, [#allocation3], %s440_s28, %s440_s28, %s441_s29  }
  0x11   :  { %437 = dma.done.wait [#allocation3], 1024  }
  0x12   :  { %438 = vsyncadd [#allocation3], 4294966272  ;;  %v442_v0 = vmov 0.0   ;;  %vm443_vm0 = vmmov 0   ;;  %v386_v1 = vld [vmem:[%s530_s1] sm:$0xff]   ;;  %v387_v2 = vld [vmem:[%s530_s1 + $0x8] sm:$0xff]   ;;  %v270_v28 = vlaneseq }
  0x13   :  { %341 = vmatprep.subr.bf16.mxu0 %v442_v0  ;;  %357 = vmatprep.mubr.msk.bf16.mxu0 %vm443_vm0, %v442_v0  ;;  %v388_v3 = vld [vmem:[%s530_s1 + $0x10] sm:$0xff]   ;;  %v395_v4 = vld [vmem:[#allocation2] sm:$0xff]   ;;  %v389_v5 = vld [vmem:[%s530_s1 + $0x18] sm:$0xff]  }
  0x14   :  { %361 = vmatprep.subr.bf16.mxu1 %v442_v0  ;;  %377 = vmatprep.mubr.msk.bf16.mxu1 %vm443_vm0, %v442_v0  ;;  %v396_v6 = vld [vmem:[#allocation2 + $0x8] sm:$0xff]   ;;  %v390_v7 = vld [vmem:[%s530_s1 + $0x20] sm:$0xff]   ;;  %v397_v8 = vld [vmem:[#allocation2 + $0x10] sm:$0xff]   ;;  %v271_v29 = vand.u32 127, %v270_v28 }
  0x15   :  { %342 = vmatpush3.bf16.msra.mxu0 %v386_v1  ;;  %362 = vmatpush3.bf16.msra.mxu1 %v395_v4  ;;  %v391_v9 = vld [vmem:[%s530_s1 + $0x28] sm:$0xff]   ;;  %v398_v10 = vld [vmem:[#allocation2 + $0x18] sm:$0xff]   ;;  %v392_v11 = vld [vmem:[%s530_s1 + $0x30] sm:$0xff]  }
  0x16   :  { %343 = vmatprep.subr.bf16.mxu0 %v442_v0  ;;  %363 = vmatprep.subr.bf16.mxu1 %v442_v0  ;;  %v393_v12 = vld [vmem:[%s530_s1 + $0x38] sm:$0xff]   ;;  %v394_v13 = vld [vmem:[%s529_s0] sm:$0xff]   ;;  %v400_v15 = vld [vmem:[#allocation2 + $0x28] sm:$0xff]   ;;  %vm272_vm1 = vcmp.lt.s32.totalorder %v271_v29, 2 }
  0x17   :  { %v399_v14 = vld [vmem:[#allocation2 + $0x20] sm:$0xff]   ;;  %v401_v16 = vld [vmem:[#allocation2 + $0x30] sm:$0xff]   ;;  %v402_v17 = vld [vmem:[#allocation2 + $0x38] sm:$0xff]  }
  0x18   :  { %v304_v18 = vld [vmem:[%s531_s2] ss:$0 sm:$0xff] }
  0x19   :  { %344 = vmatpush3.bf16.msra.mxu0 %v387_v2  ;;  %364 = vmatpush3.bf16.msra.mxu1 %v396_v6  ;;  %v314_v30 = vld [vmem:[%s533_s4] ss:$0 sm:$0xff] }
  0x1a   :  { %345 = vmatprep.subr.bf16.mxu0 %v442_v0  ;;  %365 = vmatprep.subr.bf16.mxu1 %v442_v0 }
  0x1d   :  { %346 = vmatpush3.bf16.msra.mxu0 %v388_v3  ;;  %366 = vmatpush3.bf16.msra.mxu1 %v397_v8 }
  0x1e   :  { %347 = vmatprep.subr.bf16.mxu0 %v442_v0  ;;  %367 = vmatprep.subr.bf16.mxu1 %v442_v0 }
  0x21   :  { %348 = vmatpush3.bf16.msra.mxu0 %v389_v5  ;;  %368 = vmatpush3.bf16.msra.mxu1 %v398_v10 }
  0x22   :  { %349 = vmatprep.subr.bf16.mxu0 %v442_v0  ;;  %369 = vmatprep.subr.bf16.mxu1 %v442_v0 }
  0x25   :  { %350 = vmatpush3.bf16.msra.mxu0 %v390_v7  ;;  %370 = vmatpush3.bf16.msra.mxu1 %v399_v14 }
  0x26   :  { %351 = vmatprep.subr.bf16.mxu0 %v442_v0  ;;  %371 = vmatprep.subr.bf16.mxu1 %v442_v0 }
  0x29   :  { %352 = vmatpush3.bf16.msra.mxu0 %v391_v9  ;;  %372 = vmatpush3.bf16.msra.mxu1 %v400_v15 }
  0x2a   :  { %353 = vmatprep.subr.bf16.mxu0 %v442_v0  ;;  %373 = vmatprep.subr.bf16.mxu1 %v442_v0 }
  0x2d   :  { %354 = vmatpush3.bf16.msra.mxu0 %v392_v11  ;;  %374 = vmatpush3.bf16.msra.mxu1 %v401_v16 }
  0x2e   :  { %355 = vmatprep.subr.bf16.mxu0 %v442_v0  ;;  %375 = vmatprep.subr.bf16.mxu1 %v442_v0 }
  0x31   :  { %356 = vmatpush3.bf16.msra.mxu0 %v393_v12  ;;  %376 = vmatpush3.bf16.msra.mxu1 %v402_v17 }
  0x34   :  { %358 = vmatmul.mubr.bf16.vlgmr.msra.gmra.mrb[0].mxu0 %v394_v13 }
 0x107   :  { %v148_v19 = vpop.f32.mrb[0].mxu0 }
 0x108   :  { %v149_v20 = vadd.f32 %v304_v18, %v148_v19  ;;  %v359_v21 = vpop.f32.mrb[1].mxu0 }
 0x109   :  { %v151_v22 = vpop.f32.mrb[2].mxu0 }
 0x10a   :  { %v152_v23 = vadd.f32 %v304_v18, %v151_v22  ;;  %v360_v24 = vpop.f32.mrb[3].mxu0  ;;  %403 = vtanh.f32 %v149_v20 }
 0x10c   :  { %405 = vtanh.f32 %v152_v23 }
 0x114   :  { %v404_v25 = vpop.eup %403 }
 0x116   :  { %v406_v26 = vpop.eup %405 }
 0x117   :  { %v157_v27 = vpack.c.bf16 %v406_v26, %v404_v25 }
 0x119   :  { %378 = vmatmul.mubr.bf16.vlgmr.msra.gmra.mrb[0].mxu1 %v157_v27 }
 0x1ec   :  { %v263_v31 = vpop.f32.mrb[0].mxu1 }
 0x1ed   :  { %v264_v32 = vadd.f32 %v314_v30, %v263_v31  ;;  %v379_v33 = vpop.f32.mrb[1].mxu1 }
 0x1ee   :  { %v266_v34 = vpop.f32.mrb[2].mxu1 }
 0x1ef   :  { %v267_v35 = vadd.f32 %v314_v30, %v266_v34  ;;  %v380_v36 = vpop.f32.mrb[3].mxu1  ;;  %v273_v37 = vsel %vm272_vm1, %v264_v32, -inf }
 0x1f0   :  { %275 = vmax.xlane.f32.xlu0 %v273_v37 }
 0x1f1   :  { %v274_v38 = vsel %vm272_vm1, %v267_v35, -inf }
 0x1f4   :  { %277 = vmax.xlane.f32.xlu0 %v274_v38 }
 0x27d   :  { %v276_v39 = vpop.xlane.xlu0 %275 }
 0x27e   :  { %v279_v40 = vsub.f32 %v264_v32, %v276_v39 }
 0x280   :  { %v281_v41 = vmul.f32 1.442695, %v279_v40 }
 0x281   :  { %v278_v42 = vpop.xlane.xlu0 %277 }
 0x282   :  { %407 = vpow2.f32 %v281_v41  ;;  %v280_v43 = vsub.f32 %v267_v35, %v278_v42 }
 0x284   :  { %v283_v44 = vmul.f32 1.442695, %v280_v43 }
 0x286   :  { %409 = vpow2.f32 %v283_v44 }
 0x28c   :  { %v408_v45 = vpop.eup %407 }
 0x28d   :  { %v285_v46 = vsel %vm272_vm1, %v408_v45, 0.0 }
 0x28e   :  { %287 = vadd.xlane.f32.xlu1 %v285_v46 }
 0x290   :  { %v410_v47 = vpop.eup %409 }
 0x291   :  { %v286_v48 = vsel %vm272_vm1, %v410_v47, 0.0 }
 0x292   :  { %289 = vadd.xlane.f32.xlu1 %v286_v48 }
 0x31b   :  { %v288_v49 = vpop.xlane.xlu1 %287 }
 0x31c   :  { %411 = vlog2.f32 %v288_v49 }
 0x31f   :  { %v290_v50 = vpop.xlane.xlu1 %289 }
 0x320   :  { %413 = vlog2.f32 %v290_v50 }
 0x326   :  { %v412_v51 = vpop.eup %411 }
 0x327   :  { %v292_v52 = vmul.f32 0.6931472, %v412_v51 }
 0x329   :  { %v295_v53 = vsub.f32 %v279_v40, %v292_v52 }
 0x32a   :  { %v414_v54 = vpop.eup %413 }
 0x32b   :  { %297 = vst [vmem:[%s534_s5] sm:$0xff] %v295_v53  ;;  %v294_v55 = vmul.f32 0.6931472, %v414_v54 }
 0x32d   :  { %v296_v56 = vsub.f32 %v280_v43, %v294_v55 }
 0x32f   :  { %298 = vst [vmem:[%s534_s5 + $0x8] sm:$0xff] %v296_v56 }
 0x330   :  { %303 = vsyncpa [#allocation3], 1 }

</bundles_post_ra>
